<compile_context>
chip_gen: v7x
topology: tpu7x:2x2x1
jax: 0.10.0
libtpu: 0.0.40
codegen_flags: <defaults>
</compile_context>

<pallas_src>
import math

import jax
import jax.numpy as jnp
from jax.experimental import pallas as pl
from jax.experimental.pallas import tpu as pltpu

PI = math.pi

# ~2 MiB per pipeline buffer; 4 arrays x 2 (double-buffer) ~= 16 MiB peak.
_PER_BUFFER_BYTES = 2 * 1024 * 1024
_VMEM_LIMIT_BYTES = 48 * 1024 * 1024  # explicit limit matters on v5e (16 MiB default)


def cone_negation_kernel(axis_ref, arg_ref, axis_out_ref, arg_out_ref):
    ax = axis_ref[...]
    # flip the cone axis by pi (staying in [-pi, pi))
    axis_out_ref[...] = jnp.where(ax >= 0, ax - PI, ax + PI)
    # negated aperture
    arg_out_ref[...] = PI - arg_ref[...]


def _sublane_multiple(dtype):
    """Native sublane granularity per dtype (8 for 4B, 16 for 2B, 32 for 1B)."""
    itemsize = jnp.dtype(dtype).itemsize
    if itemsize >= 4:
        return 8
    if itemsize == 2:
        return 16
    return 32


def _lane_dense_shape(B, D):
    """If D is not a multiple of 128, refactor (B, D) into an equivalent
    lane-dense (R, C) with C a multiple of 128 (no-op when already dense)."""
    if D % 128 == 0:
        return (B, D)
    total = B * D
    for c in (128 * 64, 128 * 32, 128 * 16, 128 * 8, 128 * 4, 128 * 2, 128):
        if total % c == 0:
            return (total // c, c)
    # Cannot be made lane-dense; keep original (masked stores, still correct).
    return (B, D)


def _pick_tiles(B, D, itemsize, sub):
    """Return (tb, td) block dims.

    tb is a multiple of `sub` (or == B for a tiny full-array block); td is a
    multiple of 128 (or == D).  A (tb, td) buffer fits _PER_BUFFER_BYTES and
    the grid has >= 2 steps whenever the batch can be split.
    """
    row_bytes = D * itemsize
    budget_rows = _PER_BUFFER_BYTES // max(row_bytes, 1)

    if budget_rows >= sub:
        # Full-D blocks fit the budget: tile over batch only.
        td = D
        if B < 2 * sub:
            # Too small to split into two sublane-aligned blocks; launch-bound
            # anyway, so one full-array block is fine.
            tb = B
        else:
            tb = (budget_rows // sub) * sub
            # Force at least 2 grid steps (pipelining; dual-TC sharding on v7x).
            half = ((-(-B // 2)) + sub - 1) // sub * sub
            tb = max(sub, min(tb, half))
    else:
        # Very wide D: tile D in multiples of 128 with a 2-D grid.
        tb = B if B < sub else sub
        td = max(128, (_PER_BUFFER_BYTES // (max(tb, 1) * itemsize)) // 128 * 128)
        td = min(td, D)
    return tb, td


def entity_negation(axis_embedding, arg_embedding, donate=False):
    """Pallas implementation of EntityNegation.forward.

    axis_embedding, arg_embedding: (B, D) float arrays.
    Returns (axis_out, arg_out) with the same shapes/dtypes.
    donate=True reuses the input HBM buffers for the outputs (caller must not
    reuse the inputs afterwards); footprint win on 16 GiB v5e.
    """
    assert axis_embedding.shape == arg_embedding.shape
    assert axis_embedding.dtype == arg_embedding.dtype
    orig_shape = axis_embedding.shape
    B, D = orig_shape
    dtype = axis_embedding.dtype
    itemsize = jnp.dtype(dtype).itemsize
    sub = _sublane_multiple(dtype)

    # Present a lane-dense slab (last dim multiple of 128) when possible.
    R, C = _lane_dense_shape(B, D)
    if (R, C) != (B, D):
        axis_embedding = axis_embedding.reshape(R, C)
        arg_embedding = arg_embedding.reshape(R, C)

    tb, td = _pick_tiles(R, C, itemsize, sub)

    if td == C:
        grid = (pl.cdiv(R, tb),)
        spec = pl.BlockSpec((tb, C), lambda i: (i, 0))
        dim_sem = ("parallel",)
    else:
        grid = (pl.cdiv(R, tb), pl.cdiv(C, td))
        spec = pl.BlockSpec((tb, td), lambda i, j: (i, j))
        dim_sem = ("parallel", "parallel")

    out_shapes = (
        jax.ShapeDtypeStruct((R, C), dtype),
        jax.ShapeDtypeStruct((R, C), dtype),
    )

    cost = pl.CostEstimate(
        flops=5 * R * C,                     # cmp + sub + add + select (axis), sub (arg)
        transcendentals=0,
        bytes_accessed=4 * R * C * itemsize,  # 2 reads + 2 writes
    )

    call_kwargs = {}
    if donate:
        call_kwargs["input_output_aliases"] = {0: 0, 1: 1}

    axis_out, arg_out = pl.pallas_call(
        cone_negation_kernel,
        out_shape=out_shapes,
        grid_spec=pltpu.PrefetchScalarGridSpec(
            num_scalar_prefetch=0,
            grid=grid,
            in_specs=[spec, spec],
            out_specs=[spec, spec],
        ),
        compiler_params=pltpu.CompilerParams(
            dimension_semantics=dim_sem,
            vmem_limit_bytes=_VMEM_LIMIT_BYTES,
        ),
        cost_estimate=cost,
        **call_kwargs,
    )(axis_embedding, arg_embedding)

    if (R, C) != (B, D):
        axis_out = axis_out.reshape(orig_shape)
        arg_out = arg_out.reshape(orig_shape)
    return axis_out, arg_out


def entity_negation_ref(axis_embedding, arg_embedding):
    axis_out = jnp.where(axis_embedding >= 0, axis_embedding - PI, axis_embedding + PI)
    arg_out = PI - arg_embedding
    return axis_out, arg_out


if __name__ == "__main__":
    key = jax.random.PRNGKey(0)
    k1, k2 = jax.random.split(key)

    # Primary small test: B=16, D=256 -> tb=8, grid=(2,) exercises the
    # pipelined / dual-TC multi-step path.
    B, D = 16, 256
    # ConE convention: axis in [-pi, pi), aperture (arg) in [0, pi]
    axis_embedding = jax.random.uniform(
        k1, (B, D), dtype=jnp.float32, minval=-PI, maxval=PI
    )
    arg_embedding = jax.random.uniform(
        k2, (B, D), dtype=jnp.float32, minval=0.0, maxval=PI
    )

    axis_out, arg_out = entity_negation(axis_embedding, arg_embedding)
    jax.block_until_ready((axis_out, arg_out))
    axis_expect, arg_expect = entity_negation_ref(axis_embedding, arg_embedding)
    assert jnp.allclose(axis_out, axis_expect, atol=1e-6)
    assert jnp.allclose(arg_out, arg_expect, atol=1e-6)

    # Non-128-multiple D: exercises the lane-dense reshape path (8*96 -> (6,128)).
    k3, k4 = jax.random.split(jax.random.PRNGKey(1))
    ax_small = jax.random.uniform(k3, (8, 96), dtype=jnp.float32, minval=-PI, maxval=PI)
    ar_small = jax.random.uniform(k4, (8, 96), dtype=jnp.float32, minval=0.0, maxval=PI)
    ax_s_out, ar_s_out = entity_negation(ax_small, ar_small)
    jax.block_until_ready((ax_s_out, ar_s_out))
    ax_s_ref, ar_s_ref = entity_negation_ref(ax_small, ar_small)
    assert jnp.allclose(ax_s_out, ax_s_ref, atol=1e-6)
    assert jnp.allclose(ar_s_out, ar_s_ref, atol=1e-6)

    # bf16: exercises dtype-aware sublane rounding (tb multiple of 16).
    k5, k6 = jax.random.split(jax.random.PRNGKey(2))
    ax_bf = jax.random.uniform(k5, (48, 256), dtype=jnp.float32, minval=-PI, maxval=PI).astype(jnp.bfloat16)
    ar_bf = jax.random.uniform(k6, (48, 256), dtype=jnp.float32, minval=0.0, maxval=PI).astype(jnp.bfloat16)
    ax_bf_out, ar_bf_out = entity_negation(ax_bf, ar_bf)
    jax.block_until_ready((ax_bf_out, ar_bf_out))
    ax_bf_ref, ar_bf_ref = entity_negation_ref(ax_bf, ar_bf)
    assert jnp.allclose(ax_bf_out.astype(jnp.float32), ax_bf_ref.astype(jnp.float32), atol=2e-2)
    assert jnp.allclose(ar_bf_out.astype(jnp.float32), ar_bf_ref.astype(jnp.float32), atol=2e-2)

    # Ragged multi-block batch (B not a multiple of tb).
    kb1, kb2 = jax.random.split(jax.random.PRNGKey(3))
    B2, D2 = 10007, 512
    ax_big = jax.random.uniform(kb1, (B2, D2), dtype=jnp.float32, minval=-PI, maxval=PI)
    ar_big = jax.random.uniform(kb2, (B2, D2), dtype=jnp.float32, minval=0.0, maxval=PI)
    ax_big_out, ar_big_out = entity_negation(ax_big, ar_big)
    jax.block_until_ready((ax_big_out, ar_big_out))
    ax_big_ref, ar_big_ref = entity_negation_ref(ax_big, ar_big)
    assert jnp.allclose(ax_big_out, ax_big_ref, atol=1e-6)
    assert jnp.allclose(ar_big_out, ar_big_ref, atol=1e-6)

    print("KERNEL_OK")
</pallas_src>

<mosaic_0001>
module attributes {stable_mosaic.version = 11 : i64} {
  func.func @cone_negation_kernel(%arg0: i32, %arg1: memref<8x256xf32, #tpu.memory_space<vmem>>, %arg2: memref<8x256xf32, #tpu.memory_space<vmem>>, %arg3: memref<8x256xf32, #tpu.memory_space<vmem>>, %arg4: memref<8x256xf32, #tpu.memory_space<vmem>>) attributes {dimension_semantics = [#tpu.dimension_semantics<parallel>], iteration_bounds = array<i64: 2>, scalar_prefetch = 0 : i64, scratch_operands = 0 : i64, tpu.core_type = #tpu.core_type<tc>, window_params = [{transform_indices = @transform_0, window_bounds = array<i64: 8, 256>}, {transform_indices = @transform_1, window_bounds = array<i64: 8, 256>}, {transform_indices = @transform_2, window_bounds = array<i64: 8, 256>}, {transform_indices = @transform_3, window_bounds = array<i64: 8, 256>}]} {
    %c0 = arith.constant 0 : index
    %c0_0 = arith.constant 0 : index
    %0 = vector.load %arg1[%c0, %c0_0] : memref<8x256xf32, #tpu.memory_space<vmem>>, vector<8x256xf32>
    %cst = arith.constant 0.000000e+00 : f32
    %1 = vector.broadcast %cst : f32 to vector<8x256xf32>
    %2 = arith.cmpf oge, %0, %1 : vector<8x256xf32>
    %cst_1 = arith.constant 3.14159274 : f32
    %3 = vector.broadcast %cst_1 : f32 to vector<8x256xf32>
    %4 = arith.subf %0, %3 : vector<8x256xf32>
    %cst_2 = arith.constant 3.14159274 : f32
    %5 = vector.broadcast %cst_2 : f32 to vector<8x256xf32>
    %6 = arith.addf %0, %5 : vector<8x256xf32>
    %7 = arith.select %2, %4, %6 : vector<8x256xi1>, vector<8x256xf32>
    %c0_3 = arith.constant 0 : index
    %c0_4 = arith.constant 0 : index
    %8 = vector.load %arg3[%c0_3, %c0_4] : memref<8x256xf32, #tpu.memory_space<vmem>>, vector<8x256xf32>
    tpu.vector_store %arg3[%c0_3, %c0_4], %7 {strides = array<i32>} : memref<8x256xf32, #tpu.memory_space<vmem>>, vector<8x256xf32>,
    %c0_5 = arith.constant 0 : index
    %c0_6 = arith.constant 0 : index
    %9 = vector.load %arg2[%c0_5, %c0_6] : memref<8x256xf32, #tpu.memory_space<vmem>>, vector<8x256xf32>
    %cst_7 = arith.constant 3.14159274 : f32
    %10 = vector.broadcast %cst_7 : f32 to vector<8x256xf32>
    %11 = arith.subf %10, %9 : vector<8x256xf32>
    %c0_8 = arith.constant 0 : index
    %c0_9 = arith.constant 0 : index
    %12 = vector.load %arg4[%c0_8, %c0_9] : memref<8x256xf32, #tpu.memory_space<vmem>>, vector<8x256xf32>
    tpu.vector_store %arg4[%c0_8, %c0_9], %11 {strides = array<i32>} : memref<8x256xf32, #tpu.memory_space<vmem>>, vector<8x256xf32>,
    return
  }
  func.func @transform_0(%arg0: i32) -> (i32, i32) {
    %c0_i32 = arith.constant 0 : i32
    %c0_i32_0 = arith.constant 0 : i32
    return %arg0, %c0_i32 : i32, i32
  }
  func.func @transform_1(%arg0: i32) -> (i32, i32) {
    %c0_i32 = arith.constant 0 : i32
    %c0_i32_0 = arith.constant 0 : i32
    return %arg0, %c0_i32 : i32, i32
  }
  func.func @transform_2(%arg0: i32) -> (i32, i32) {
    %c0_i32 = arith.constant 0 : i32
    %c0_i32_0 = arith.constant 0 : i32
    return %arg0, %c0_i32 : i32, i32
  }
  func.func @transform_3(%arg0: i32) -> (i32, i32) {
    %c0_i32 = arith.constant 0 : i32
    %c0_i32_0 = arith.constant 0 : i32
    return %arg0, %c0_i32 : i32, i32
  }
}

</mosaic_0001>

<bundles_post_ra>
// kernel: tpu_custom_call.1
= control target key start
LH: loop header
LB: loop body
LE: loop exit
PB: predicated region body
PF: predicated region fallthrough
CT: control target
= control target key end

     0   :  { %9 = vsyncpa [#allocation3], 0  ;;  %s923_s0 = inlined_call_operand.hbm [shape: f32[16,256], index: 0, kind: input, shape index: {}]   ;;  %s924_s1 = inlined_call_operand.hbm [shape: f32[16,256], index: 1, kind: input, shape index: {}]   ;;  %s925_s2 = inlined_call_operand.hbm [shape: f32[16,256], index: 2, kind: output, shape index: {0}]   ;;  %s926_s3 = inlined_call_operand.hbm [shape: f32[16,256], index: 3, kind: output, shape index: {1}]  }
   0x1   :  { %11 = vsyncpa [#allocation3 + $0x1], 0 }
   0x2   :  { %12 = vsyncpa [#allocation6], 0 }
   0x3   :  { %14 = vsyncpa [#allocation6 + $0x1], 0 }
   0x4   :  { %15 = vsyncpa [#allocation4], 0 }
   0x5   :  { %17 = vsyncpa [#allocation4 + $0x1], 0 }
   0x6   :  { %18 = vsyncpa [#allocation9], 0 }
   0x7   :  { %20 = vsyncpa [#allocation9 + $0x1], 0  ;;  %s685_s12 = smov 0   ;;  %s687_s13 = smov 0  }
   0x8   :  { %s689_s14 = smov 0   ;;  %s691_s15 = smov 0  }
   0x9 LB: > { %s706_s16 = sadd.s32 4294967295, %s659_s15   ;;  %s413_s17 = sadd.s32 4294967294, %s659_s15   ;;  %s659_s15 = sphi %s691_s15, %s945_s15   ;;  %s655_s14 = sphi %s689_s14, %s944_s14   ;;  %s651_s13 = sphi %s687_s13, %s943_s13   ;;  %s647_s12 = sphi %s685_s12, %s942_s12  }
   0xa   : > { %s710_s18 = sadd.s32 1, %s659_s15   ;;  %s33_s19 = sadd.s32 1, %s655_s14 }
   0xb   : > { %s30_s20 = ssub.s32 %s659_s15, %s710_s18  ;;  %p40_p0 = scmp.ne.s32.totalorder %s655_s14, %s651_s13 }
   0xc   : > { %p31_p1 = scmp.eq.s32.totalorder %s30_s20, 0  ;;  %p41_p2 = scmp.eq.s32.totalorder %s659_s15, 0 }
   0xd   : > { %p46_p3 = scmp.ne.s32.totalorder %s651_s13, %s647_s12  ;;  %p47_p4 = scmp.eq.s32.totalorder %s706_s16, 0 }
   0xe   : > { %s722_s21 = scalar_select %p31_p1, %s655_s14, %s33_s19  }
   0xf   : > { %p724_p5 = por %p41_p2, %p40_p0  ;;  %p728_p6 = por %p47_p4, %p46_p3 }
  0x10   : > { %p96_p7 = scmp.eq.s32.totalorder %s706_s16, 1  ;;  %p102_p8 = scmp.eq.s32.totalorder %s413_s17, 1 }
  0x11   : > { %s930_s23 = scalar_select %p728_p6, 1, 0 }
  0x12   : > { %p463_p10 = scmp.lt.s32.totalorder %s659_s15, 2  ;;  %p735_p11 = por %p96_p7, %p40_p0 }
  0x13   : > { %p739_p12 = por %p102_p8, %p46_p3  ;;  %s744_s26 = sand.u32 1, %s655_s14  }
  0x14   : > { %s931_s24 = scalar_select %p735_p11, 1, 0 }
  0x15   : > { %s932_s25 = scalar_select %p739_p12, 1, 0 }
  0x16   : > { %s437_s27 = sshll.u32 %s659_s15, 8  ;;  %s416_s28 = sshll.u32 %s744_s26, 4 }
  0x17   : > { %s753_s4 = scalar_lea.hbm %s923_s0, %s437_s27  ;;  %s152_s5 = scalar_lea.vmem [#allocation2], %s416_s28 }
  0x18   : > { %s160_s6 = sshll.u32 %s152_s5, 4  ;;  %p759_p13 = pnand %p463_p10, %p724_p5  ;;  %s763_s6 = int_to_ptr.vmem [resolvable:$true] %s160_s6 }
  0x19   : > { %s149_s8 = scalar_lea.sflag [#allocation3], %s744_s26  ;;  %s497_s9 = scalar_lea.hbm %s753_s4, 256 }
  0x1a   : > { %p498_p2 = scmp.ne.s32.totalorder %s753_s4, %s497_s9  ;;  %p499_p3 = pneg %p759_p13 }
  0x1b   : > { %s502_s17 = scalar_lea.hbm %s923_s0, 512  ;;  %p503_p5 = scmp.lt.u32.totalorder %s753_s4, %s923_s0 }
  0x1c   : > { %p500_p4 = pnand %p499_p3, %p498_p2  ;;  %p504_p8 = scmp.lt.u32.totalorder %s502_s17, %s497_s9 }
  0x1d   : > { %p506_p9 = scmp.lt.u32.totalorder %s497_s9, %s753_s4 }
  0x1e   : > { %p501_p7 = pneg %p500_p4  ;;  %p505_p10 = por %p504_p8, %p503_p5 }
  0x20   : > { %p507_p0 = por %p506_p9, %p505_p10 }
  0x22   : > { %p508_p1 = pnand %p507_p0, %p501_p7 }
  0x24   : > { %511 = shalt.err (!%p508_p1)
}
  0x25   : > { %s512_s22 = scalar_lea.vmem %s763_s6, 256  ;;  %s661_s29 = smov [#allocation2]  }
  0x26   : > { %p513_p2 = scmp.ne.s32.totalorder %s763_s6, %s512_s22  ;;  %s517_s30 = sshll.u32 %s661_s29, 4  ;;  %s518_s30 = int_to_ptr.vmem [resolvable:$false] %s517_s30 }
  0x27   : > { %s519_s5 = scalar_lea.vmem %s518_s30, 512  ;;  %p520_p11 = scmp.lt.s32.totalorder %s763_s6, %s518_s30 }
  0x28   : > { %p515_p4 = pnand %p513_p2, %p499_p3  ;;  %p521_p5 = scmp.lt.s32.totalorder %s519_s5, %s512_s22 }
  0x2a   : > { %p516_p12 = pneg %p515_p4  ;;  %p522_p8 = por %p521_p5, %p520_p11 }
  0x2c   : > { %p523_p9 = pnand %p522_p8, %p516_p12 }
  0x2e   : > { %526 = shalt.err (!%p523_p9)
}
  0x2f   : > { %452 = dma.hbm_to_vmem [thread:$0]  (!%p759_p13), %s753_s4, 256, %s763_s6, %s149_s8  }
  0x30   : > { %p934_p0 = scmp.lt.s32.totalorder %s659_s15, 3  ;;  %p935_p1 = scmp.ge.s32.totalorder %s659_s15, 1 }
  0x31   : > { %s806_s17 = scalar_lea.hbm %s924_s1, %s437_s27  ;;  %s171_s19 = scalar_lea.vmem [#allocation5], %s416_s28 }
  0x32   : > { %p797_p7 = pnand %p935_p1, %p934_p0  ;;  %s179_s20 = sshll.u32 %s171_s19, 4  ;;  %s180_s20 = int_to_ptr.vmem [resolvable:$true] %s179_s20 }
  0x33   : > { %s168_s4 = scalar_lea.sflag [#allocation6], %s744_s26  ;;  %s527_s6 = scalar_lea.hbm %s806_s17, 256 }
  0x34   : > { %s936_s9 = scalar_select %p797_p7, 1, 0 }
  0x35   : > { %p528_p11 = scmp.ne.s32.totalorder %s806_s17, %s527_s6  ;;  %s532_s27 = scalar_lea.hbm %s924_s1, 512 }
  0x36   : > { %p533_p2 = scmp.lt.u32.totalorder %s806_s17, %s924_s1  ;;  %p534_p4 = scmp.lt.u32.totalorder %s532_s27, %s527_s6 }
  0x37   : > { %p530_p12 = pnand %p528_p11, %p499_p3  ;;  %p536_p8 = scmp.lt.u32.totalorder %s527_s6, %s806_s17 }
  0x38   : > { %p535_p5 = por %p534_p4, %p533_p2 }
  0x39   : > { %p531_p10 = pneg %p530_p12 }
  0x3a   : > { %p537_p9 = por %p536_p8, %p535_p5 }
  0x3c   : > { %p538_p0 = pnand %p537_p9, %p531_p10 }
  0x3e   : > { %541 = shalt.err (!%p538_p0)
}
  0x3f   : > { %s542_s26 = scalar_lea.vmem %s180_s20, 256  ;;  %s662_s28 = smov [#allocation5]  }
  0x40   : > { %p543_p1 = scmp.ne.s32.totalorder %s180_s20, %s542_s26  ;;  %s547_s5 = sshll.u32 %s662_s28, 4  ;;  %s548_s5 = int_to_ptr.vmem [resolvable:$false] %s547_s5 }
  0x41   : > { %s549_s10 = scalar_lea.vmem %s548_s5, 512  ;;  %p550_p6 = scmp.lt.s32.totalorder %s180_s20, %s548_s5 }
  0x42   : > { %p545_p11 = pnand %p543_p1, %p499_p3  ;;  %p551_p7 = scmp.lt.s32.totalorder %s549_s10, %s542_s26 }
  0x44   : > { %p546_p12 = pneg %p545_p11  ;;  %p552_p2 = por %p551_p7, %p550_p6 }
  0x46   : > { %p553_p4 = pnand %p552_p2, %p546_p12 }
  0x48   : > { %556 = shalt.err (!%p553_p4)
}
  0x49   : > { %455 = dma.hbm_to_vmem [thread:$0]  (!%p759_p13), %s806_s17, 256, %s180_s20, %s168_s4  }
  0x4a   : > { %p937_p10 = scmp.ne.s32.totalorder %s936_s9, 0 }
  0x4b   : > { %s833_s11 = sand.u32 (!%p937_p10), 1, %s651_s13   ;;  %p938_p3 = scmp.ne.s32.totalorder (!%p937_p10), %s930_s23, 0 }
  0x4c   : > { %188 = sbr.rel (%p937_p10) target bundleno = 137 (0x89), region = 28  ;;  %s423_s19 = sshll.u32 (!%p937_p10), %s833_s11, 4 }
  0x4d   : > { %s191_s6 = scalar_lea.sflag (!%p937_p10), [#allocation3], %s833_s11  ;;  %s194_s8 = scalar_lea.vmem (!%p937_p10), [#allocation2], %s423_s19 }
  0x53   : > { %630 = dma.done.wait (%p938_p3), %s191_s6, 256  }
  0x54   : > { %632 = vsyncadd (%p938_p3), %s191_s6, 4294967040  ;;  %s200_s7 = scalar_lea.sflag [#allocation6], %s833_s11  ;;  %s203_s17 = scalar_lea.vmem [#allocation5], %s423_s19 }
  0x55   : > { %634 = dma.done.wait (%p938_p3), %s200_s7, 256  }
  0x56   : > { %636 = vsyncadd (%p938_p3), %s200_s7, 4294967040  ;;  %s228_s9 = scalar_lea.vmem [#allocation7], %s423_s19  ;;  %s235_s4 = scalar_lea.vmem [#allocation8], %s423_s19  ;;  %v236_v0 = vld [vmem:[%s194_s8] sm:$0xff]  ;;  %v237_v1 = vld [vmem:[%s194_s8 + $0x8] sm:$0xff] }
  0x57   : > { %s274_s20 = sshll.u32 %s228_s9, 4  ;;  %s288_s22 = sshll.u32 %s235_s4, 4  ;;  %v248_v2 = vld [vmem:[%s203_s17] sm:$0xff]  ;;  %vm238_vm0 = vcmp.ge.f32.partialorder %v236_v0, 0.0  ;;  %v427_v3 = vadd.f32 -3.1415927, %v236_v0  ;;  %s847_s20 = int_to_ptr.vmem [resolvable:$true] %s274_s20  ;;  %s849_s22 = int_to_ptr.vmem [resolvable:$true] %s288_s22 }
  0x58   : > { %s439_s27 = sshll.u32 %s706_s16, 8  ;;  %v242_v4 = vadd.f32 3.1415927, %v236_v0  ;;  %vm239_vm1 = vcmp.ge.f32.partialorder %v237_v1, 0.0  ;;  %v428_v5 = vadd.f32 -3.1415927, %v237_v1 }
  0x59   : > { %v243_v6 = vadd.f32 3.1415927, %v237_v1  ;;  %v250_v7 = vsub.f32 3.1415927, %v248_v2  ;;  %v249_v9 = vld [vmem:[%s203_s17 + $0x8] sm:$0xff]  ;;  %s854_s16 = scalar_lea.hbm %s925_s2, %s439_s27  ;;  %s859_s28 = scalar_lea.hbm %s926_s3, %s439_s27 }
  0x5a   : > { %v244_v8 = vsel %vm238_vm0, %v427_v3, %v242_v4  ;;  %v251_v11 = vsub.f32 3.1415927, %v249_v9  ;;  %s255_s5 = scalar_lea.sflag [#allocation4], %s833_s11  ;;  %s557_s10 = scalar_lea.vmem %s847_s20, 256 }
  0x5b   : > { %246 = vst [vmem:[%s228_s9] sm:$0xff] %v244_v8  ;;  %v245_v10 = vsel %vm239_vm1, %v428_v5, %v243_v6  ;;  %252 = vst [vmem:[%s235_s4] sm:$0xff] %v250_v7  ;;  %p558_p6 = scmp.ne.s32.totalorder %s847_s20, %s557_s10  ;;  %p939_p13 = scmp.ne.s32.totalorder %s931_s24, 0 }
  0x5c   : > { %247 = vst [vmem:[%s228_s9 + $0x8] sm:$0xff] %v245_v10  ;;  %253 = vst [vmem:[%s235_s4 + $0x8] sm:$0xff] %v251_v11  ;;  %s663_s19 = smov [#allocation7]  }
  0x5d   : > { %p559_p7 = pnand %p558_p6, %p939_p13  ;;  %s561_s6 = sshll.u32 %s663_s19, 4  ;;  %s562_s6 = int_to_ptr.vmem [resolvable:$false] %s561_s6 }
  0x5e   : > { %s563_s8 = scalar_lea.vmem %s562_s6, 512  ;;  %p564_p8 = scmp.lt.s32.totalorder %s847_s20, %s562_s6 }
  0x5f   : > { %p560_p5 = pneg %p559_p7  ;;  %p565_p9 = scmp.lt.s32.totalorder %s563_s8, %s557_s10 }
  0x61   : > { %p566_p0 = por %p565_p9, %p564_p8 }
  0x63   : > { %p567_p1 = pnand %p566_p0, %p560_p5 }
  0x65   : > { %570 = shalt.err (!%p567_p1)
}
  0x66   : > { %s571_s7 = scalar_lea.hbm %s854_s16, 256  ;;  %s575_s4 = scalar_lea.hbm %s925_s2, 512 }
  0x67   : > { %p572_p11 = scmp.ne.s32.totalorder %s854_s16, %s571_s7  ;;  %p576_p4 = scmp.lt.u32.totalorder %s854_s16, %s925_s2 }
  0x68   : > { %p577_p10 = scmp.lt.u32.totalorder %s575_s4, %s571_s7  ;;  %p579_p6 = scmp.lt.u32.totalorder %s571_s7, %s854_s16 }
  0x69   : > { %p573_p12 = pnand %p572_p11, %p939_p13 }
  0x6a   : > { %p578_p3 = por %p577_p10, %p576_p4 }
  0x6b   : > { %p574_p2 = pneg %p573_p12 }
  0x6c   : > { %p580_p7 = por %p579_p6, %p578_p3 }
  0x6e   : > { %p581_p5 = pnand %p580_p7, %p574_p2 }
  0x70   : > { %584 = shalt.err (!%p581_p5)
}
  0x71   : > { %445 = dma.vmem_to_hbm [thread:$0]  (%p939_p13), %s847_s20, 256, %s854_s16, %s255_s5  }
  0x72   : > { %s260_s29 = scalar_lea.sflag [#allocation9], %s833_s11  ;;  %s585_s30 = scalar_lea.vmem %s849_s22, 256 }
  0x73   : > { %p586_p8 = scmp.ne.s32.totalorder %s849_s22, %s585_s30  ;;  %s664_s26 = smov [#allocation8]  }
  0x74   : > { %s589_s10 = sshll.u32 %s664_s26, 4  ;;  %s590_s10 = int_to_ptr.vmem [resolvable:$false] %s589_s10 }
  0x75   : > { %p587_p9 = pnand %p586_p8, %p939_p13  ;;  %s591_s19 = scalar_lea.vmem %s590_s10, 512 }
  0x76   : > { %p592_p1 = scmp.lt.s32.totalorder %s849_s22, %s590_s10  ;;  %p593_p11 = scmp.lt.s32.totalorder %s591_s19, %s585_s30 }
  0x77   : > { %p588_p0 = pneg %p587_p9 }
  0x78   : > { %p594_p12 = por %p593_p11, %p592_p1 }
  0x7a   : > { %p595_p2 = pnand %p594_p12, %p588_p0 }
  0x7c   : > { %598 = shalt.err (!%p595_p2)
}
  0x7d   : > { %s599_s11 = scalar_lea.hbm %s859_s28, 256  ;;  %s603_s5 = scalar_lea.hbm %s926_s3, 512 }
  0x7e   : > { %p600_p4 = scmp.ne.s32.totalorder %s859_s28, %s599_s11  ;;  %p604_p6 = scmp.lt.u32.totalorder %s859_s28, %s926_s3 }
  0x7f   : > { %p605_p7 = scmp.lt.u32.totalorder %s603_s5, %s599_s11  ;;  %p607_p8 = scmp.lt.u32.totalorder %s599_s11, %s859_s28 }
  0x80   : > { %p601_p10 = pnand %p600_p4, %p939_p13 }
  0x81   : > { %p606_p5 = por %p605_p7, %p604_p6 }
  0x82   : > { %p602_p3 = pneg %p601_p10 }
  0x83   : > { %p608_p9 = por %p607_p8, %p606_p5 }
  0x85   : > { %p609_p0 = pnand %p608_p9, %p602_p3 }
  0x87   : > { %612 = shalt.err (!%p609_p0)
}
  0x88   : > { %446 = dma.vmem_to_hbm [thread:$0]  (%p939_p13), %s849_s22, 256, %s859_s28, %s260_s29  }
  0x89 PF: > { %s300_s7 = sand.u32 1, %s647_s12   ;;  %p940_p1 = scmp.ne.s32.totalorder %s932_s25, 0 }
  0x8a   : > { %p941_p11 = scmp.ge.s32.totalorder %s659_s15, 2  ;;  %s301_s17 = scalar_lea.sflag [#allocation4], %s300_s7 }
  0x8c   : > { %p457_p12 = pnand %p941_p11, %p940_p1 }
  0x8e   : > { %638 = dma.done.wait (!%p457_p12), %s301_s17, 256  }
  0x8f   : > { %640 = vsyncadd (!%p457_p12), %s301_s17, 4294967040  ;;  %s310_s9 = scalar_lea.sflag [#allocation9], %s300_s7 }
  0x90   : > { %642 = dma.done.wait (!%p457_p12), %s310_s9, 256  }
  0x91   : > { %644 = vsyncadd (!%p457_p12), %s310_s9, 4294967040  ;;  %p23_p13 = scmp.ge.s32.totalorder %s710_s18, 4   ;;  %s942_s12 = smov %s651_s13 }
  0x92   : > { %s943_s13 = smov %s655_s14  ;;  %s944_s14 = smov %s722_s21 }
  0x93   : > { %s945_s15 = smov %s710_s18  ;;  %25 = sbr.rel (!%p23_p13) target bundleno = 9 (0x9), region = 103 }
  0x9a   :  { %315 = vsyncpa [#allocation3], 1 }
  0x9b   :  { %317 = vsyncpa [#allocation3 + $0x1], 1 }
  0x9c   :  { %318 = vsyncpa [#allocation6], 1 }
  0x9d   :  { %320 = vsyncpa [#allocation6 + $0x1], 1 }
  0x9e   :  { %321 = vsyncpa [#allocation4], 1 }
  0x9f   :  { %323 = vsyncpa [#allocation4 + $0x1], 1 }
  0xa0   :  { %324 = vsyncpa [#allocation9], 1 }
  0xa1   :  { %326 = vsyncpa [#allocation9 + $0x1], 1 }

</bundles_post_ra>
